<compile_context>
chip_gen: v5e
topology: v5e:2x2
jax: 0.10.0
libtpu: 0.0.40
codegen_flags: <defaults>
</compile_context>

<pallas_src>
import functools

import jax
import jax.numpy as jnp
from jax.experimental import pallas as pl
from jax.experimental.pallas import tpu as pltpu

_LANE = 128      # lane width (last dim)
_SUBLANE = 8     # sublane width (second-to-last dim)
_MAX_TM = 512    # batch-tile cap (rows per grid step)


def _round_up(x, m):
    return (x + m - 1) // m * m


def _vmem_capacity_bytes():
    """Physical VMEM per TensorCore (64 MiB on v7x, 128 MiB on v5e/v6e)."""
    try:
        return int(pltpu.get_tpu_info().vmem_capacity_bytes)
    except Exception:                       # fall back to smallest (v7x) size
        return 64 * 1024 * 1024


def _est_vmem_bytes(tm, padded, weight_bytes, compute_dtype):
    """Rough residency estimate with single-buffered weights."""
    in_item = jnp.dtype(compute_dtype).itemsize
    in_bytes = 2 * tm * padded[0] * in_item        # double-buffered input tile
    out_bytes = 2 * tm * padded[-1] * 4            # double-buffered f32 output tile
    inter_bytes = 2 * tm * max(padded) * 4         # f32 intermediates (generous)
    return weight_bytes + in_bytes + out_bytes + inter_bytes


def _choose_batch_tile(B, padded, weight_bytes, compute_dtype, budget):
    tm = min(_round_up(B, _SUBLANE), _MAX_TM)
    if B > 128:
        # v7x megacore: ensure at least 2 parallel grid steps so both TCs work.
        tm = min(tm, _round_up((B + 1) // 2, _SUBLANE))
    while tm > _SUBLANE and _est_vmem_bytes(tm, padded, weight_bytes,
                                            compute_dtype) > budget:
        tm = max(_SUBLANE, _round_up(tm // 2, _SUBLANE))
    est = _est_vmem_bytes(tm, padded, weight_bytes, compute_dtype)
    # TODO(synk): if resident weights alone overflow the budget, switch to a
    # K/N-tiled grid with a VMEM accumulator instead of fused weight residency.
    assert est <= budget, (
        f"fused-resident MLP needs ~{est} bytes of VMEM (budget {budget}); "
        "tile K/N instead")
    return tm


def _fused_mlp_kernel(*refs, num_layers, compute_dtype):
    """out = relu(... relu(relu(x@W0+b0) @ W1 + b1) ... @ W_{L-1} + b_{L-1}).

    refs = (x_ref, w0_ref, b0_ref, ..., w_{L-1}_ref, b_{L-1}_ref, o_ref).
    The layer loop is unrolled; intermediate activations never leave the core.
    """
    x_ref = refs[0]
    o_ref = refs[1 + 2 * num_layers]

    h = x_ref[...]                             # already compute_dtype (bf16)
    for layer in range(num_layers):
        w_ref = refs[1 + 2 * layer]
        b_ref = refs[2 + 2 * layer]
        if layer > 0:
            h = h.astype(compute_dtype)        # single cast, right before the dot
        acc = jnp.dot(h, w_ref[...], preferred_element_type=jnp.float32)
        # f32 epilogue: bias + ReLU on every layer, including the last
        # (MLPBase's last_activation_func defaults to activation_func).
        h = jnp.maximum(acc + b_ref[...], 0.0)
    o_ref[...] = h.astype(o_ref.dtype)


def prepare_mlp_params(params, *, in_dim, compute_dtype=jnp.bfloat16):
    """One-time weight prep (padding + cast), hoisted out of the forward path.

    params: list of (W[K_in, N_out], b[N_out]) f32 arrays ([in, out] layout,
    i.e. transposed vs. PyTorch nn.Linear.weight).
    """
    widths = [int(in_dim)] + [int(w.shape[1]) for (w, _) in params]
    padded = [_round_up(d, _LANE) for d in widths]

    weights, biases = [], []
    weight_bytes = 0
    for l, (w, b) in enumerate(params):
        k_in, n_out = w.shape
        w_pad = jnp.zeros((padded[l], padded[l + 1]), compute_dtype)
        w_pad = w_pad.at[:k_in, :n_out].set(w.astype(compute_dtype))
        b_pad = jnp.zeros((1, padded[l + 1]), jnp.float32)
        b_pad = b_pad.at[0, :n_out].set(b.astype(jnp.float32))
        weights.append(w_pad)
        biases.append(b_pad)
        weight_bytes += (w_pad.size * jnp.dtype(compute_dtype).itemsize
                         + b_pad.size * 4)

    return dict(weights=weights, biases=biases, widths=widths, padded=padded,
                weight_bytes=weight_bytes, compute_dtype=compute_dtype)


def mlp_base_forward(x, prepared):
    """MLPBase.forward as a single fused Pallas call.

    x: [B, K] float32;  prepared: output of prepare_mlp_params().
    """
    compute_dtype = prepared["compute_dtype"]
    widths, padded = prepared["widths"], prepared["padded"]
    num_layers = len(prepared["weights"])

    B, K = x.shape
    assert K == widths[0], f"expected input width {widths[0]}, got {K}"

    # Generation-aware VMEM budget (~48 MiB on v7x, ~96 MiB on v5e/v6e).
    vmem_cap = _vmem_capacity_bytes()
    vmem_limit = min(96 * 1024 * 1024, (vmem_cap * 3) // 4)
    budget = vmem_limit - 4 * 1024 * 1024      # headroom for compiler scratch

    tm = _choose_batch_tile(B, padded, prepared["weight_bytes"],
                            compute_dtype, budget)
    b_pad = _round_up(B, tm)

    # Zero-pad the input directly in compute dtype (half the DMA bytes vs f32);
    # padded lanes/rows contribute exactly 0 downstream because padded weight
    # rows/cols and bias lanes are also zero.
    x_pad = jnp.zeros((b_pad, padded[0]), compute_dtype)
    x_pad = x_pad.at[:B, :K].set(x.astype(compute_dtype))

    vmem = pltpu.MemorySpace.VMEM
    inputs = [x_pad]
    in_specs = [pl.BlockSpec((tm, padded[0]), lambda i: (i, 0),
                             memory_space=vmem)]
    for w_pad, b_pad2 in zip(prepared["weights"], prepared["biases"]):
        inputs += [w_pad, b_pad2]
        # Full-array, memory_space-only specs: one VMEM-resident copy each,
        # no per-grid-step re-fetch and no double buffering.
        in_specs += [pl.BlockSpec(memory_space=vmem),
                     pl.BlockSpec(memory_space=vmem)]

    out_spec = pl.BlockSpec((tm, padded[-1]), lambda i: (i, 0),
                            memory_space=vmem)

    out_pad = pl.pallas_call(
        functools.partial(_fused_mlp_kernel, num_layers=num_layers,
                          compute_dtype=compute_dtype),
        out_shape=jax.ShapeDtypeStruct((b_pad, padded[-1]), x.dtype),
        grid=(b_pad // tm,),
        in_specs=in_specs,
        out_specs=out_spec,
        compiler_params=pltpu.CompilerParams(
            dimension_semantics=("parallel",),
            vmem_limit_bytes=vmem_limit),
    )(*inputs)

    return out_pad[:B, :widths[-1]]


def init_mlp_params(key, input_shape, hidden_shapes):
    """Deterministic fan-in uniform init (stand-in for init.basic_init)."""
    params = []
    in_dim = 1
    for d in input_shape:
        in_dim *= int(d)
    for h in hidden_shapes:
        key, kw, kb = jax.random.split(key, 3)
        bound = 1.0 / float(in_dim) ** 0.5
        w = jax.random.uniform(kw, (in_dim, h), jnp.float32, -bound, bound)
        b = jax.random.uniform(kb, (h,), jnp.float32, -bound, bound)
        params.append((w, b))
        in_dim = h
    return params


def mlp_base_reference(x, params, compute_dtype=jnp.float32):
    out = x.astype(jnp.float32)
    for w, b in params:
        acc = jnp.dot(out.astype(compute_dtype), w.astype(compute_dtype),
                      preferred_element_type=jnp.float32)
        out = jnp.maximum(acc + b.astype(jnp.float32), 0.0)
    return out


if __name__ == "__main__":
    key = jax.random.PRNGKey(0)
    kx, kp = jax.random.split(key)

    batch = 8
    input_shape = (16,)        # np.prod(input_shape) = 16
    hidden_shapes = (32, 32)

    x = jax.random.normal(kx, (batch, input_shape[0]), jnp.float32)
    params = init_mlp_params(kp, input_shape, hidden_shapes)

    # One-time weight prep (padding + bf16 cast), reused across forwards.
    prepared = prepare_mlp_params(params, in_dim=input_shape[0])

    out = jax.block_until_ready(mlp_base_forward(x, prepared))

    ref_bf16 = mlp_base_reference(x, params, jnp.bfloat16)  # matches kernel math
    ref_f32 = mlp_base_reference(x, params, jnp.float32)    # pure-f32 reference

    assert out.shape == (batch, hidden_shapes[-1])
    assert jnp.allclose(out, ref_bf16, atol=1e-3, rtol=1e-3)
    assert jnp.allclose(out, ref_f32, atol=5e-2, rtol=5e-2)

    print("KERNEL_OK")
</pallas_src>

<mosaic_0001>
module attributes {stable_mosaic.version = 11 : i64} {
  func.func @_fused_mlp_kernel(%arg0: i32, %arg1: memref<8x128xbf16, #tpu.memory_space<vmem>>, %arg2: memref<128x128xbf16, #tpu.memory_space<vmem>>, %arg3: memref<1x128xf32, #tpu.memory_space<vmem>>, %arg4: memref<128x128xbf16, #tpu.memory_space<vmem>>, %arg5: memref<1x128xf32, #tpu.memory_space<vmem>>, %arg6: memref<8x128xf32, #tpu.memory_space<vmem>>) attributes {dimension_semantics = [#tpu.dimension_semantics<parallel>], iteration_bounds = array<i64: 1>, scalar_prefetch = 0 : i64, scratch_operands = 0 : i64, tpu.core_type = #tpu.core_type<tc>, window_params = [{transform_indices = @transform_0, window_bounds = array<i64: 8, 128>}, {pipeline_mode = #tpu.pipeline_mode<synchronous>, transform_indices = @transform_1, window_bounds = array<i64: 128, 128>}, {pipeline_mode = #tpu.pipeline_mode<synchronous>, transform_indices = @transform_2, window_bounds = array<i64: 1, 128>}, {pipeline_mode = #tpu.pipeline_mode<synchronous>, transform_indices = @transform_3, window_bounds = array<i64: 128, 128>}, {pipeline_mode = #tpu.pipeline_mode<synchronous>, transform_indices = @transform_4, window_bounds = array<i64: 1, 128>}, {transform_indices = @transform_5, window_bounds = array<i64: 8, 128>}]} {
    %c0 = arith.constant 0 : index
    %c0_0 = arith.constant 0 : index
    %0 = vector.load %arg1[%c0, %c0_0] : memref<8x128xbf16, #tpu.memory_space<vmem>>, vector<8x128xbf16>
    %c0_1 = arith.constant 0 : index
    %c0_2 = arith.constant 0 : index
    %1 = vector.load %arg2[%c0_1, %c0_2] : memref<128x128xbf16, #tpu.memory_space<vmem>>, vector<128x128xbf16>
    %cst = arith.constant dense<0.000000e+00> : vector<8x128xf32>
    %2 = tpu.matmul %0, %1, %cst {dimension_numbers = #tpu.dot_dimension_numbers<[1], [0], [0], [1], [0, 0, 1, 1], [], []>} : vector<8x128xbf16>, vector<128x128xbf16>, vector<8x128xf32> -> vector<8x128xf32>
    %c0_3 = arith.constant 0 : index
    %c0_4 = arith.constant 0 : index
    %3 = vector.load %arg3[%c0_3, %c0_4] : memref<1x128xf32, #tpu.memory_space<vmem>>, vector<1x128xf32>
    %4 = vector.broadcast %3 : vector<1x128xf32> to vector<8x128xf32>
    %5 = arith.addf %2, %4 : vector<8x128xf32>
    %cst_5 = arith.constant 0.000000e+00 : f32
    %6 = vector.broadcast %cst_5 : f32 to vector<8x128xf32>
    %7 = arith.maximumf %5, %6 : vector<8x128xf32>
    %8 = arith.truncf %7 : vector<8x128xf32> to vector<8x128xbf16>
    %c0_6 = arith.constant 0 : index
    %c0_7 = arith.constant 0 : index
    %9 = vector.load %arg4[%c0_6, %c0_7] : memref<128x128xbf16, #tpu.memory_space<vmem>>, vector<128x128xbf16>
    %cst_8 = arith.constant dense<0.000000e+00> : vector<8x128xf32>
    %10 = tpu.matmul %8, %9, %cst_8 {dimension_numbers = #tpu.dot_dimension_numbers<[1], [0], [0], [1], [0, 0, 1, 1], [], []>} : vector<8x128xbf16>, vector<128x128xbf16>, vector<8x128xf32> -> vector<8x128xf32>
    %c0_9 = arith.constant 0 : index
    %c0_10 = arith.constant 0 : index
    %11 = vector.load %arg5[%c0_9, %c0_10] : memref<1x128xf32, #tpu.memory_space<vmem>>, vector<1x128xf32>
    %12 = vector.broadcast %11 : vector<1x128xf32> to vector<8x128xf32>
    %13 = arith.addf %10, %12 : vector<8x128xf32>
    %cst_11 = arith.constant 0.000000e+00 : f32
    %14 = vector.broadcast %cst_11 : f32 to vector<8x128xf32>
    %15 = arith.maximumf %13, %14 : vector<8x128xf32>
    %c0_12 = arith.constant 0 : index
    %c0_13 = arith.constant 0 : index
    %16 = vector.load %arg6[%c0_12, %c0_13] : memref<8x128xf32, #tpu.memory_space<vmem>>, vector<8x128xf32>
    tpu.vector_store %arg6[%c0_12, %c0_13], %15 {strides = array<i32>} : memref<8x128xf32, #tpu.memory_space<vmem>>, vector<8x128xf32>,
    return
  }
  func.func @transform_0(%arg0: i32) -> (i32, i32) {
    %c0_i32 = arith.constant 0 : i32
    %c0_i32_0 = arith.constant 0 : i32
    return %arg0, %c0_i32 : i32, i32
  }
  func.func @transform_1(%arg0: i32) -> (i32, i32) {
    %c0_i32 = arith.constant 0 : i32
    %c0_i32_0 = arith.constant 0 : i32
    %c0_i32_1 = arith.constant 0 : i32
    return %c0_i32, %c0_i32_0 : i32, i32
  }
  func.func @transform_2(%arg0: i32) -> (i32, i32) {
    %c0_i32 = arith.constant 0 : i32
    %c0_i32_0 = arith.constant 0 : i32
    %c0_i32_1 = arith.constant 0 : i32
    return %c0_i32, %c0_i32_0 : i32, i32
  }
  func.func @transform_3(%arg0: i32) -> (i32, i32) {
    %c0_i32 = arith.constant 0 : i32
    %c0_i32_0 = arith.constant 0 : i32
    %c0_i32_1 = arith.constant 0 : i32
    return %c0_i32, %c0_i32_0 : i32, i32
  }
  func.func @transform_4(%arg0: i32) -> (i32, i32) {
    %c0_i32 = arith.constant 0 : i32
    %c0_i32_0 = arith.constant 0 : i32
    %c0_i32_1 = arith.constant 0 : i32
    return %c0_i32, %c0_i32_0 : i32, i32
  }
  func.func @transform_5(%arg0: i32) -> (i32, i32) {
    %c0_i32 = arith.constant 0 : i32
    %c0_i32_0 = arith.constant 0 : i32
    return %arg0, %c0_i32 : i32, i32
  }
}

</mosaic_0001>

<bundles_post_ra>
// kernel: tpu_custom_call.1
= control target key start
LH: loop header
LB: loop body
LE: loop exit
PB: predicated region body
PF: predicated region fallthrough
CT: control target
= control target key end

     0   :  { %10 = vsyncpa [#allocation3], 0  ;;  %s495_s0 = inlined_call_operand.hbm [shape: bf16[8,128], index: 0, kind: input, shape index: {}]   ;;  %s496_s1 = inlined_call_operand.hbm [shape: bf16[128,128], index: 1, kind: input, shape index: {}]   ;;  %s497_s2 = inlined_call_operand.vmem [shape: f32[1,128], index: 2, kind: input, shape index: {}]   ;;  %s498_s3 = inlined_call_operand.hbm [shape: bf16[128,128], index: 3, kind: input, shape index: {}]   ;;  %s499_s4 = inlined_call_operand.vmem [shape: f32[1,128], index: 4, kind: input, shape index: {}]   ;;  %s500_s5 = inlined_call_operand.hbm [shape: f32[8,128], index: 5, kind: output, shape index: {}]  }
   0x1   :  { %11 = vsyncpa [#allocation6], 0  ;;  %s28_s20 = sshll.u32 %s496_s1, 4  ;;  %s29_s20 = int_to_ptr.hbm [resolvable:$true] %s28_s20 }
   0x2   :  { %12 = vsyncpa [#allocation4], 0  ;;  %s441_s21 = smov [#allocation5]   ;;  %s18_s25 = sshll.u32 %s495_s0, 4  ;;  %s19_s25 = int_to_ptr.hbm [resolvable:$true] %s18_s25 }
   0x3   :  { %s30_s22 = sshll.u32 %s441_s21, 4  ;;  %s442_s26 = smov 64   ;;  %s31_s22 = int_to_ptr.vmem [resolvable:$true] %s30_s22 }
   0x4   :  { %s443_s27 = smov 4   ;;  %s444_s28 = smov [#allocation2]  }
   0x5   :  { %36 = dma.hbm_to_vmem [thread:$0]  %s29_s20, 1024, %s31_s22, [#allocation6], %s442_s26, %s442_s26, %s443_s27  }
   0x6   :  { %s20_s29 = sshll.u32 %s444_s28, 4  ;;  %s43_s7 = sshll.u32 %s498_s3, 4  ;;  %s21_s29 = int_to_ptr.vmem [resolvable:$true] %s20_s29  ;;  %s44_s7 = int_to_ptr.hbm [resolvable:$true] %s43_s7 }
   0x7   :  { %23 = dma.hbm_to_vmem [thread:$0]  %s19_s25, 64, %s21_s29, [#allocation3]  }
   0x8   :  { %s445_s1 = smov [#allocation7]  }
   0x9   :  { %s45_s8 = sshll.u32 %s445_s1, 4  ;;  %s46_s8 = int_to_ptr.vmem [resolvable:$true] %s45_s8 }
   0xa   :  { %51 = dma.hbm_to_vmem [thread:$0]  %s44_s7, 1024, %s46_s8, [#allocation6], %s442_s26, %s442_s26, %s443_s27  }
   0xb   :  { %435 = dma.done.wait [#allocation3], 64  }
   0xc   :  { %436 = vsyncadd [#allocation3], 4294967232 }
   0xd   :  { %437 = dma.done.wait [#allocation6], 2048  }
   0xe   :  { %438 = vsyncadd [#allocation6], 4294965248  ;;  %v322_v0 = vld [vmem:[#allocation5 + $0x38] sm:$0xff]  ;;  %v321_v1 = vld [vmem:[#allocation5 + $0x30] sm:$0xff]  ;;  %s446_s11 = smov [#allocation8]   ;;  %s240_s15 = sshll.u32 %s500_s5, 4  ;;  %s241_s15 = int_to_ptr.hbm [resolvable:$true] %s240_s15 }
   0xf   :  { %135 = vmatpush.bf16.msra.mxu0 %v322_v0  ;;  %v330_v2 = vld [vmem:[#allocation7 + $0x38] sm:$0xff]  ;;  %v329_v3 = vld [vmem:[#allocation7 + $0x30] sm:$0xff]  ;;  %v320_v4 = vld [vmem:[#allocation5 + $0x28] sm:$0xff]  ;;  %s238_s12 = sshll.u32 %s446_s11, 4  ;;  %s239_s12 = int_to_ptr.vmem [resolvable:$true] %s238_s12 }
  0x10   :  { %218 = vmatpush.bf16.msra.mxu1 %v330_v2  ;;  %v328_v5 = vld [vmem:[#allocation7 + $0x28] sm:$0xff]  ;;  %v319_v6 = vld [vmem:[#allocation5 + $0x20] sm:$0xff]  ;;  %v318_v8 = vld [vmem:[#allocation5 + $0x18] sm:$0xff] }
  0x11   :  { %v327_v7 = vld [vmem:[#allocation7 + $0x20] sm:$0xff]  ;;  %v326_v9 = vld [vmem:[#allocation7 + $0x18] sm:$0xff]  ;;  %v317_v10 = vld [vmem:[#allocation5 + $0x10] sm:$0xff] }
  0x12   :  { %v325_v11 = vld [vmem:[#allocation7 + $0x10] sm:$0xff]  ;;  %v316_v12 = vld [vmem:[#allocation5 + $0x8] sm:$0xff]  ;;  %v315_v13 = vld [vmem:[#allocation5] sm:$0xff] }
  0x13   :  { %136 = vmatpush.bf16.msra.mxu0 %v321_v1  ;;  %v66_v14 = vld [vmem:[#allocation2] sm:$0xf]  ;;  %v324_v15 = vld [vmem:[#allocation7 + $0x8] sm:$0xff]  ;;  %v323_v16 = vld [vmem:[#allocation7] sm:$0xff] }
  0x14   :  { %219 = vmatpush.bf16.msra.mxu1 %v329_v3  ;;  %v337_v17 = vld [vmem:[%s497_s2] ss:$0 sm:$0xff] }
  0x15   :  { %v338_v23 = vld [vmem:[%s499_s4] ss:$0 sm:$0xff] }
  0x17   :  { %137 = vmatpush.bf16.msra.mxu0 %v320_v4 }
  0x18   :  { %220 = vmatpush.bf16.msra.mxu1 %v328_v5 }
  0x1b   :  { %138 = vmatpush.bf16.msra.mxu0 %v319_v6 }
  0x1c   :  { %221 = vmatpush.bf16.msra.mxu1 %v327_v7 }
  0x1f   :  { %139 = vmatpush.bf16.msra.mxu0 %v318_v8 }
  0x20   :  { %222 = vmatpush.bf16.msra.mxu1 %v326_v9 }
  0x23   :  { %140 = vmatpush.bf16.msra.mxu0 %v317_v10 }
  0x24   :  { %223 = vmatpush.bf16.msra.mxu1 %v325_v11 }
  0x27   :  { %141 = vmatpush.bf16.msra.mxu0 %v316_v12 }
  0x28   :  { %224 = vmatpush.bf16.msra.mxu1 %v324_v15 }
  0x2b   :  { %142 = vmatpush.bf16.msra.mxu0 %v315_v13 }
  0x2c   :  { %225 = vmatpush.bf16.msra.mxu1 %v323_v16 }
  0x2e   :  { %143 = vmatmul.bf16.vlgmr.msra.gmra.mxu0 %v66_v14 }
  0xab   :  { %v144_v18 = vpop.f32.mrf.mxu0 }
  0xac   :  { %v145_v19 = vadd.f32 %v337_v17, %v144_v18 }
  0xae   :  { %v148_v20 = vmax.f32 %v145_v19, 0.0 }
  0xb0   :  { %v149_v21 = vpack.c.bf16 %v148_v20, %v148_v20 }
  0xb2   :  { %226 = vmatmul.bf16.vlgmr.msra.gmra.mxu1 %v149_v21 }
  0xb3   :  { %v146_v22 = vpop.f32.mrf.mxu0 }
 0x12f   :  { %v227_v24 = vpop.f32.mrf.mxu1 }
 0x130   :  { %v228_v25 = vadd.f32 %v338_v23, %v227_v24 }
 0x132   :  { %v231_v26 = vmax.f32 %v228_v25, 0.0 }
 0x134   :  { %232 = vst [vmem:[#allocation8] sm:$0xff] %v231_v26 }
 0x135   :  { %243 = dma.vmem_to_hbm [thread:$0]  %s239_s12, 128, %s241_s15, [#allocation4]  }
 0x137   :  { %v229_v27 = vpop.f32.mrf.mxu1 }
 0x138   :  { %439 = dma.done.wait [#allocation4], 128  }
 0x139   :  { %440 = vsyncadd [#allocation4], 4294967168 }
 0x13a   :  { %248 = vsyncpa [#allocation3], 1 }
 0x13b   :  { %249 = vsyncpa [#allocation6], 1 }
 0x13c   :  { %250 = vsyncpa [#allocation4], 1 }

</bundles_post_ra>
